<compile_context>
chip_gen: v5e
topology: v5e:2x2
jax: 0.10.0
libtpu: 0.0.40
codegen_flags: <defaults>
</compile_context>

<pallas_src>
import functools

import jax
import jax.numpy as jnp
from jax import lax
from jax.experimental import pallas as pl
from jax.experimental.pallas import tpu as pltpu


def _round_up(x, m):
    return (x + m - 1) // m * m


def _pad_to(a, shape):
    pads = [(0, t - s) for s, t in zip(a.shape, shape)]
    return jnp.pad(a, pads)


def patchify(images, patch):
    B, C, H, W = images.shape
    hp, wp = H // patch, W // patch
    x = images.reshape(B, C, hp, patch, wp, patch)
    x = x.transpose(0, 2, 4, 1, 3, 5)              # (B, hp, wp, C, p, p)
    return x.reshape(B, hp * wp, C * patch * patch)


# ----------------------- fused encode + pool + head kernel -------------------
# grid = (Bpad // G,): G batch elements per step.  Each step encodes
# (G*Np_pad, P_pad) image tokens and (G*S_pad, E_pad) saml tokens (bf16 MXU,
# f32 accumulation), pools per batch with direct reductions, projects,
# L2-normalizes and writes two lane-dense (G, Fp) output blocks.

def clip_fused_kernel(img_tok_ref, saml_tok_ref, lens_ref, invlen_ref,
                      w_ei_ref, b_ei_ref, w_es_ref, b_es_ref,
                      w_pi_ref, b_pi_ref, w_ps_ref, b_ps_ref,
                      img_out_ref, saml_out_ref,
                      *, g, np_tok, s_tok, inv_np):
    f32 = jnp.float32

    # ---- image branch: one big MXU pass over G*Np token rows, then pool ----
    # TODO(synk): real encoders are arbitrary injected nn.Modules; modeled as
    # per-token linear layers (padding_mask is a no-op for such an encoder).
    img_feat = jnp.dot(img_tok_ref[...], w_ei_ref[...],
                       preferred_element_type=f32)                  # (g*np, Dip)
    dip = img_feat.shape[-1]
    img_feat = img_feat.reshape(g, np_tok, dip)
    # Bias applied after pooling: mean(xW + b) == mean(xW) + b.  Zero-padded
    # token rows contribute 0 to the sum, so inv_np uses the real Np count.
    img_pool = jnp.sum(img_feat, axis=1) * inv_np + b_ei_ref[...]    # (g, Dip)

    # ---- saml branch: encode + masked mean (iota-vs-length, exact 1/len) ----
    saml_feat = jnp.dot(saml_tok_ref[...], w_es_ref[...],
                        preferred_element_type=f32)                  # (g*s, Dsp)
    dsp = saml_feat.shape[-1]
    saml_feat = saml_feat.reshape(g, s_tok, dsp)
    tok = lax.broadcasted_iota(jnp.int32, (g, s_tok, dsp), 1)
    lens = lens_ref[...][:, :, None]                                 # (g,1,1) i32
    invlen = invlen_ref[...][:, :, None]                             # (g,1,1) f32
    # NOTE: an all-false mask row (length 0) yields the bias vector here instead
    # of the NaN PyTorch would produce; padded batch rows are discarded anyway.
    w = jnp.where(tok < lens, invlen, 0.0)                           # token weights
    saml_pool = jnp.sum(saml_feat * w, axis=1) + b_es_ref[...]       # (g, Dsp)

    # ---- fused head: projection + L2 normalize (hidden under encode MXU) ----
    img_p = jnp.dot(img_pool.astype(jnp.bfloat16), w_pi_ref[...],
                    preferred_element_type=f32) + b_pi_ref[...]      # (g, Fp)
    saml_p = jnp.dot(saml_pool.astype(jnp.bfloat16), w_ps_ref[...],
                     preferred_element_type=f32) + b_ps_ref[...]     # (g, Fp)

    def l2norm(x):
        # F.normalize(dim=-1): x / max(||x||, 1e-12) == x * rsqrt(max(ss, 1e-24))
        ss = jnp.sum(x * x, axis=-1, keepdims=True)
        return x * lax.rsqrt(jnp.maximum(ss, 1e-24))

    img_out_ref[...] = l2norm(img_p)
    saml_out_ref[...] = l2norm(saml_p)


# --------------------------------- wrapper -----------------------------------

def clip_forward(images, sequences, mask, params, *, patch=4, target_rows=512):
    B, C, H, W = images.shape
    _, S, E = sequences.shape
    Np = (H // patch) * (W // patch)
    P_DIM = C * patch * patch

    D_IMG = params["w_ei"].shape[1]
    D_SAML = params["w_es"].shape[1]
    F_DIM = params["w_pi"].shape[1]

    # Lane-dense padding: contraction dims (K) and matmul output columns to 128,
    # per-batch token rows to 16 (bf16 sublane packing).  Zero padding is inert.
    P_pad = _round_up(P_DIM, 128)
    E_pad = _round_up(E, 128)
    Dip = _round_up(D_IMG, 128)
    Dsp = _round_up(D_SAML, 128)
    Fp = _round_up(F_DIM, 128)
    Np_pad = _round_up(Np, 16)
    S_pad = _round_up(S, 16)

    # Batch-group size G: coarsen so each grid step feeds the MXU >= target_rows
    # image-token rows; when the grid has >1 step G is a multiple of 8 so the
    # (G, *) output / length blocks satisfy the (8, 128) divisibility rule.
    # At production B this also yields >= 4 steps for v7x megacore splitting.
    g_raw = max(1, target_rows // Np_pad)
    if g_raw >= B:
        G, Bpad = B, B
    else:
        G = _round_up(g_raw, 8)
        if G >= B:
            G, Bpad = B, B
        else:
            Bpad = _round_up(B, G)
    num_steps = Bpad // G

    bf = jnp.bfloat16
    f32 = jnp.float32

    # Weights: zero-pad rows (contraction) and columns (lane-dense outputs);
    # all MXU operands in bf16, biases stay f32 (added post-accumulation).
    w_ei = _pad_to(params["w_ei"], (P_pad, Dip)).astype(bf)
    b_ei = _pad_to(params["b_ei"], (1, Dip)).astype(f32)
    w_es = _pad_to(params["w_es"], (E_pad, Dsp)).astype(bf)
    b_es = _pad_to(params["b_es"], (1, Dsp)).astype(f32)
    w_pi = _pad_to(params["w_pi"], (Dip, Fp)).astype(bf)
    b_pi = _pad_to(params["b_pi"], (1, Fp)).astype(f32)
    w_ps = _pad_to(params["w_ps"], (Dsp, Fp)).astype(bf)
    b_ps = _pad_to(params["b_ps"], (1, Fp)).astype(f32)

    # Token slabs in bf16 (dominant HBM traffic halved), padded then flattened.
    img_tok = _pad_to(patchify(images, patch), (Bpad, Np_pad, P_pad)).astype(bf)
    img_tok = img_tok.reshape(Bpad * Np_pad, P_pad)
    saml_tok = _pad_to(sequences, (Bpad, S_pad, E_pad)).astype(bf)
    saml_tok = saml_tok.reshape(Bpad * S_pad, E_pad)

    # Per-batch lengths + exact reciprocal replace the per-token mask column.
    # TODO(synk): assumes a prefix-style padding mask (mask == arange < length);
    # an arbitrary mask would need a per-token (G, S_pad) mask block instead.
    if mask is None:
        lengths = jnp.full((B,), S, dtype=jnp.int32)
    else:
        lengths = mask.astype(jnp.int32).sum(axis=1)
    lengths = _pad_to(lengths, (Bpad,))                 # padded batches: length 0
    invlen = 1.0 / lengths.astype(f32)                  # inf for 0, never selected
    lens_col = lengths.reshape(Bpad, 1)
    invlen_col = invlen.reshape(Bpad, 1)

    inv_np = 1.0 / float(Np)

    flops = (2 * Bpad * Np_pad * P_pad * Dip
             + 2 * Bpad * S_pad * E_pad * Dsp
             + 2 * Bpad * (Dip + Dsp) * Fp)
    bytes_accessed = (img_tok.size * 2 + saml_tok.size * 2
                      + (w_ei.size + w_es.size + w_pi.size + w_ps.size) * 2
                      + (b_ei.size + b_es.size + b_pi.size + b_ps.size) * 4
                      + Bpad * 8 + 2 * Bpad * Fp * 4)

    img_n_pad, saml_n_pad = pl.pallas_call(
        functools.partial(clip_fused_kernel, g=G, np_tok=Np_pad, s_tok=S_pad,
                          inv_np=inv_np),
        grid=(num_steps,),
        out_shape=(jax.ShapeDtypeStruct((Bpad, Fp), f32),
                   jax.ShapeDtypeStruct((Bpad, Fp), f32)),
        in_specs=[
            pl.BlockSpec((G * Np_pad, P_pad), lambda i: (i, 0)),  # image tokens
            pl.BlockSpec((G * S_pad, E_pad), lambda i: (i, 0)),   # saml tokens
            pl.BlockSpec((G, 1), lambda i: (i, 0)),               # lengths (i32)
            pl.BlockSpec((G, 1), lambda i: (i, 0)),               # 1/length (f32)
            # Grid-invariant weights/biases (block pinned to (0, 0)).
            # TODO(synk): on v7x (64 MiB VMEM) mark these pipeline_mode=
            # pl.Buffered(1) and on v5e raise token-slab buffering to Buffered(3)
            # once the production G*Np tile is adopted.
            pl.BlockSpec((P_pad, Dip), lambda i: (0, 0)),         # w_ei
            pl.BlockSpec((1, Dip), lambda i: (0, 0)),             # b_ei
            pl.BlockSpec((E_pad, Dsp), lambda i: (0, 0)),         # w_es
            pl.BlockSpec((1, Dsp), lambda i: (0, 0)),             # b_es
            pl.BlockSpec((Dip, Fp), lambda i: (0, 0)),            # w_pi
            pl.BlockSpec((1, Fp), lambda i: (0, 0)),              # b_pi
            pl.BlockSpec((Dsp, Fp), lambda i: (0, 0)),            # w_ps
            pl.BlockSpec((1, Fp), lambda i: (0, 0)),              # b_ps
        ],
        out_specs=(
            pl.BlockSpec((G, Fp), lambda i: (i, 0)),
            pl.BlockSpec((G, Fp), lambda i: (i, 0)),
        ),
        compiler_params=pltpu.CompilerParams(
            dimension_semantics=("parallel",),
            vmem_limit_bytes=32 * 1024 * 1024),
        cost_estimate=pl.CostEstimate(flops=flops, transcendentals=2 * Bpad,
                                      bytes_accessed=bytes_accessed),
    )(img_tok, saml_tok, lens_col, invlen_col,
      w_ei, b_ei, w_es, b_es, w_pi, b_pi, w_ps, b_ps)

    # Tiny (B, B) logits in plain XLA (second pallas_call removed per review).
    img_n = img_n_pad[:B]
    saml_n = saml_n_pad[:B]
    # TODO(synk): at production B, emit saml_n pre-transposed ((Fp, B) layout)
    # from the kernel so this contraction needs no transpose/relayout.
    return img_n @ saml_n.T * jnp.exp(params["logit_scale"])


# ------------------------------ pure-JAX reference ---------------------------

def clip_reference(images, sequences, mask, params, *, patch=4):
    """Mirrors the PyTorch forward with the kernel's operand dtypes
    (bf16 MXU inputs, f32 accumulation, f32 elementwise)."""
    bf = jnp.bfloat16
    img_tok = patchify(images, patch).astype(bf)                     # (B, Np, P)
    img_feat = jnp.dot(img_tok, params["w_ei"].astype(bf),
                       preferred_element_type=jnp.float32) + params["b_ei"]
    saml_feat = jnp.dot(sequences.astype(bf), params["w_es"].astype(bf),
                        preferred_element_type=jnp.float32) + params["b_es"]

    img_pool = img_feat.mean(axis=1)                                 # (B, Di)
    if mask is None:
        saml_pool = saml_feat.mean(axis=1)
    else:
        m = mask.astype(jnp.float32)[..., None]                      # (B, S, 1)
        saml_pool = (saml_feat * m).sum(axis=1) / m.sum(axis=1)      # (B, Ds)

    img_p = jnp.dot(img_pool.astype(bf), params["w_pi"].astype(bf),
                    preferred_element_type=jnp.float32) + params["b_pi"]
    saml_p = jnp.dot(saml_pool.astype(bf), params["w_ps"].astype(bf),
                     preferred_element_type=jnp.float32) + params["b_ps"]

    def l2norm(x):
        n = jnp.sqrt(jnp.sum(x * x, axis=-1, keepdims=True))
        return x / jnp.maximum(n, 1e-12)

    return l2norm(img_p) @ l2norm(saml_p).T * jnp.exp(params["logit_scale"])


if __name__ == "__main__":
    # Small shapes consistent with the module's forward.
    B, C, H, W = 2, 4, 16, 16        # images (NCHW)
    S, E = 8, 16                     # sequences (B, S, E)
    PATCH = 4
    P_DIM = C * PATCH * PATCH        # 64 per-patch feature dim
    D_IMG = 32                       # image_encoder.dim
    D_SAML = 24                      # saml_encoder.dim
    F_DIM = 32                       # final_dim (scaled down from 512 default)

    key = jax.random.PRNGKey(0)
    ks = jax.random.split(key, 12)

    params = {
        "w_ei": jax.random.normal(ks[0], (P_DIM, D_IMG), jnp.float32) * 0.02,
        "b_ei": jax.random.normal(ks[1], (1, D_IMG), jnp.float32) * 0.02,
        "w_es": jax.random.normal(ks[2], (E, D_SAML), jnp.float32) * 0.02,
        "b_es": jax.random.normal(ks[3], (1, D_SAML), jnp.float32) * 0.02,
        "w_pi": jax.random.normal(ks[4], (D_IMG, F_DIM), jnp.float32) * 0.02,
        "b_pi": jax.random.normal(ks[5], (1, F_DIM), jnp.float32) * 0.02,
        "w_ps": jax.random.normal(ks[6], (D_SAML, F_DIM), jnp.float32) * 0.02,
        "b_ps": jax.random.normal(ks[7], (1, F_DIM), jnp.float32) * 0.02,
        "logit_scale": jnp.array(0.7, jnp.float32),
    }

    images = jax.random.normal(ks[8], (B, C, H, W), jnp.float32)
    sequences = jax.random.normal(ks[9], (B, S, E), jnp.float32)
    lengths = jnp.array([S, 5], jnp.int32)                      # ragged mask
    mask = (jnp.arange(S)[None, :] < lengths[:, None])          # (B, S) bool

    logits = jax.block_until_ready(clip_forward(images, sequences, mask, params,
                                                patch=PATCH))
    ref = jax.block_until_ready(clip_reference(images, sequences, mask, params,
                                               patch=PATCH))

    assert logits.shape == (B, B), logits.shape
    # Tolerance covers bf16 MXU-operand rounding (same operand dtypes on both sides).
    assert jnp.allclose(logits, ref, rtol=1e-2, atol=1e-2), (logits, ref)
    print("KERNEL_OK")
</pallas_src>

<mosaic_0001>
module attributes {stable_mosaic.version = 11 : i64} {
  func.func @clip_fused_kernel(%arg0: i32, %arg1: memref<32x128xbf16, #tpu.memory_space<vmem>>, %arg2: memref<32x128xbf16, #tpu.memory_space<vmem>>, %arg3: memref<2x1xi32, #tpu.memory_space<vmem>>, %arg4: memref<2x1xf32, #tpu.memory_space<vmem>>, %arg5: memref<128x128xbf16, #tpu.memory_space<vmem>>, %arg6: memref<1x128xf32, #tpu.memory_space<vmem>>, %arg7: memref<128x128xbf16, #tpu.memory_space<vmem>>, %arg8: memref<1x128xf32, #tpu.memory_space<vmem>>, %arg9: memref<128x128xbf16, #tpu.memory_space<vmem>>, %arg10: memref<1x128xf32, #tpu.memory_space<vmem>>, %arg11: memref<128x128xbf16, #tpu.memory_space<vmem>>, %arg12: memref<1x128xf32, #tpu.memory_space<vmem>>, %arg13: memref<2x128xf32, #tpu.memory_space<vmem>>, %arg14: memref<2x128xf32, #tpu.memory_space<vmem>>) attributes {dimension_semantics = [#tpu.dimension_semantics<parallel>], iteration_bounds = array<i64: 1>, scalar_prefetch = 0 : i64, scratch_operands = 0 : i64, tpu.core_type = #tpu.core_type<tc>, window_params = [{transform_indices = @transform_0, window_bounds = array<i64: 32, 128>}, {transform_indices = @transform_1, window_bounds = array<i64: 32, 128>}, {transform_indices = @transform_2, window_bounds = array<i64: 2, 1>}, {transform_indices = @transform_3, window_bounds = array<i64: 2, 1>}, {pipeline_mode = #tpu.pipeline_mode<synchronous>, transform_indices = @transform_4, window_bounds = array<i64: 128, 128>}, {pipeline_mode = #tpu.pipeline_mode<synchronous>, transform_indices = @transform_5, window_bounds = array<i64: 1, 128>}, {pipeline_mode = #tpu.pipeline_mode<synchronous>, transform_indices = @transform_6, window_bounds = array<i64: 128, 128>}, {pipeline_mode = #tpu.pipeline_mode<synchronous>, transform_indices = @transform_7, window_bounds = array<i64: 1, 128>}, {pipeline_mode = #tpu.pipeline_mode<synchronous>, transform_indices = @transform_8, window_bounds = array<i64: 128, 128>}, {pipeline_mode = #tpu.pipeline_mode<synchronous>, transform_indices = @transform_9, window_bounds = array<i64: 1, 128>}, {pipeline_mode = #tpu.pipeline_mode<synchronous>, transform_indices = @transform_10, window_bounds = array<i64: 128, 128>}, {pipeline_mode = #tpu.pipeline_mode<synchronous>, transform_indices = @transform_11, window_bounds = array<i64: 1, 128>}, {transform_indices = @transform_12, window_bounds = array<i64: 2, 128>}, {transform_indices = @transform_13, window_bounds = array<i64: 2, 128>}]} {
    %c0 = arith.constant 0 : index
    %c0_0 = arith.constant 0 : index
    %0 = vector.load %arg1[%c0, %c0_0] : memref<32x128xbf16, #tpu.memory_space<vmem>>, vector<32x128xbf16>
    %c0_1 = arith.constant 0 : index
    %c0_2 = arith.constant 0 : index
    %1 = vector.load %arg5[%c0_1, %c0_2] : memref<128x128xbf16, #tpu.memory_space<vmem>>, vector<128x128xbf16>
    %cst = arith.constant dense<0.000000e+00> : vector<32x128xf32>
    %2 = tpu.matmul %0, %1, %cst {dimension_numbers = #tpu.dot_dimension_numbers<[1], [0], [0], [1], [0, 0, 1, 1], [], []>} : vector<32x128xbf16>, vector<128x128xbf16>, vector<32x128xf32> -> vector<32x128xf32>
    %3 = vector.shape_cast %2 : vector<32x128xf32> to vector<2x16x128xf32>
    %cst_3 = arith.constant dense<0.000000e+00> : vector<2x128xf32>
    %4 = vector.multi_reduction <add>, %3, %cst_3 [1] : vector<2x16x128xf32> to vector<2x128xf32>
    %cst_4 = arith.constant 6.250000e-02 : f32
    %5 = vector.broadcast %cst_4 : f32 to vector<2x128xf32>
    %6 = arith.mulf %4, %5 : vector<2x128xf32>
    %c0_5 = arith.constant 0 : index
    %c0_6 = arith.constant 0 : index
    %7 = vector.load %arg6[%c0_5, %c0_6] : memref<1x128xf32, #tpu.memory_space<vmem>>, vector<1x128xf32>
    %8 = vector.broadcast %7 : vector<1x128xf32> to vector<2x128xf32>
    %9 = arith.addf %6, %8 : vector<2x128xf32>
    %c0_7 = arith.constant 0 : index
    %c0_8 = arith.constant 0 : index
    %10 = vector.load %arg2[%c0_7, %c0_8] : memref<32x128xbf16, #tpu.memory_space<vmem>>, vector<32x128xbf16>
    %c0_9 = arith.constant 0 : index
    %c0_10 = arith.constant 0 : index
    %11 = vector.load %arg7[%c0_9, %c0_10] : memref<128x128xbf16, #tpu.memory_space<vmem>>, vector<128x128xbf16>
    %cst_11 = arith.constant dense<0.000000e+00> : vector<32x128xf32>
    %12 = tpu.matmul %10, %11, %cst_11 {dimension_numbers = #tpu.dot_dimension_numbers<[1], [0], [0], [1], [0, 0, 1, 1], [], []>} : vector<32x128xbf16>, vector<128x128xbf16>, vector<32x128xf32> -> vector<32x128xf32>
    %13 = vector.shape_cast %12 : vector<32x128xf32> to vector<2x16x128xf32>
    %14 = tpu.iota {dimensions = array<i32: 1>} : vector<2x16x128xi32>
    %c0_12 = arith.constant 0 : index
    %c0_13 = arith.constant 0 : index
    %15 = vector.load %arg3[%c0_12, %c0_13] : memref<2x1xi32, #tpu.memory_space<vmem>>, vector<2x1xi32>
    %16 = vector.shape_cast %15 : vector<2x1xi32> to vector<2x1x1xi32>
    %c0_14 = arith.constant 0 : index
    %c0_15 = arith.constant 0 : index
    %17 = vector.load %arg4[%c0_14, %c0_15] : memref<2x1xf32, #tpu.memory_space<vmem>>, vector<2x1xf32>
    %18 = vector.shape_cast %17 : vector<2x1xf32> to vector<2x1x1xf32>
    %19 = vector.broadcast %16 : vector<2x1x1xi32> to vector<2x16x128xi32>
    %20 = arith.cmpi slt, %14, %19 : vector<2x16x128xi32>
    %cst_16 = arith.constant 0.000000e+00 : f32
    %21 = vector.shape_cast %18 : vector<2x1x1xf32> to vector<2x1x1xf32>
    %22 = vector.broadcast %21 : vector<2x1x1xf32> to vector<2x16x128xf32>
    %23 = vector.broadcast %cst_16 : f32 to vector<2x16x128xf32>
    %24 = arith.select %20, %22, %23 : vector<2x16x128xi1>, vector<2x16x128xf32>
    %25 = arith.mulf %13, %24 : vector<2x16x128xf32>
    %cst_17 = arith.constant dense<0.000000e+00> : vector<2x128xf32>
    %26 = vector.multi_reduction <add>, %25, %cst_17 [1] : vector<2x16x128xf32> to vector<2x128xf32>
    %c0_18 = arith.constant 0 : index
    %c0_19 = arith.constant 0 : index
    %27 = vector.load %arg8[%c0_18, %c0_19] : memref<1x128xf32, #tpu.memory_space<vmem>>, vector<1x128xf32>
    %28 = vector.broadcast %27 : vector<1x128xf32> to vector<2x128xf32>
    %29 = arith.addf %26, %28 : vector<2x128xf32>
    %30 = arith.truncf %9 : vector<2x128xf32> to vector<2x128xbf16>
    %c0_20 = arith.constant 0 : index
    %c0_21 = arith.constant 0 : index
    %31 = vector.load %arg9[%c0_20, %c0_21] : memref<128x128xbf16, #tpu.memory_space<vmem>>, vector<128x128xbf16>
    %cst_22 = arith.constant dense<0.000000e+00> : vector<2x128xf32>
    %32 = tpu.matmul %30, %31, %cst_22 {dimension_numbers = #tpu.dot_dimension_numbers<[1], [0], [0], [1], [0, 0, 1, 1], [], []>} : vector<2x128xbf16>, vector<128x128xbf16>, vector<2x128xf32> -> vector<2x128xf32>
    %c0_23 = arith.constant 0 : index
    %c0_24 = arith.constant 0 : index
    %33 = vector.load %arg10[%c0_23, %c0_24] : memref<1x128xf32, #tpu.memory_space<vmem>>, vector<1x128xf32>
    %34 = vector.broadcast %33 : vector<1x128xf32> to vector<2x128xf32>
    %35 = arith.addf %32, %34 : vector<2x128xf32>
    %36 = arith.truncf %29 : vector<2x128xf32> to vector<2x128xbf16>
    %c0_25 = arith.constant 0 : index
    %c0_26 = arith.constant 0 : index
    %37 = vector.load %arg11[%c0_25, %c0_26] : memref<128x128xbf16, #tpu.memory_space<vmem>>, vector<128x128xbf16>
    %cst_27 = arith.constant dense<0.000000e+00> : vector<2x128xf32>
    %38 = tpu.matmul %36, %37, %cst_27 {dimension_numbers = #tpu.dot_dimension_numbers<[1], [0], [0], [1], [0, 0, 1, 1], [], []>} : vector<2x128xbf16>, vector<128x128xbf16>, vector<2x128xf32> -> vector<2x128xf32>
    %c0_28 = arith.constant 0 : index
    %c0_29 = arith.constant 0 : index
    %39 = vector.load %arg12[%c0_28, %c0_29] : memref<1x128xf32, #tpu.memory_space<vmem>>, vector<1x128xf32>
    %40 = vector.broadcast %39 : vector<1x128xf32> to vector<2x128xf32>
    %41 = arith.addf %38, %40 : vector<2x128xf32>
    %42 = arith.mulf %35, %35 : vector<2x128xf32>
    %cst_30 = arith.constant dense<0.000000e+00> : vector<2xf32>
    %43 = vector.multi_reduction <add>, %42, %cst_30 [1] : vector<2x128xf32> to vector<2xf32>
    %44 = vector.shape_cast %43 : vector<2xf32> to vector<2x1xf32>
    %cst_31 = arith.constant 1.000000e-24 : f32
    %45 = vector.broadcast %cst_31 : f32 to vector<2x1xf32>
    %46 = arith.maximumf %44, %45 : vector<2x1xf32>
    %47 = math.rsqrt %46 : vector<2x1xf32>
    %48 = vector.broadcast %47 : vector<2x1xf32> to vector<2x128xf32>
    %49 = arith.mulf %35, %48 : vector<2x128xf32>
    %c0_32 = arith.constant 0 : index
    %c0_33 = arith.constant 0 : index
    %50 = vector.load %arg13[%c0_32, %c0_33] : memref<2x128xf32, #tpu.memory_space<vmem>>, vector<2x128xf32>
    tpu.vector_store %arg13[%c0_32, %c0_33], %49 {strides = array<i32>} : memref<2x128xf32, #tpu.memory_space<vmem>>, vector<2x128xf32>,
    %51 = arith.mulf %41, %41 : vector<2x128xf32>
    %cst_34 = arith.constant dense<0.000000e+00> : vector<2xf32>
    %52 = vector.multi_reduction <add>, %51, %cst_34 [1] : vector<2x128xf32> to vector<2xf32>
    %53 = vector.shape_cast %52 : vector<2xf32> to vector<2x1xf32>
    %cst_35 = arith.constant 1.000000e-24 : f32
    %54 = vector.broadcast %cst_35 : f32 to vector<2x1xf32>
    %55 = arith.maximumf %53, %54 : vector<2x1xf32>
    %56 = math.rsqrt %55 : vector<2x1xf32>
    %57 = vector.broadcast %56 : vector<2x1xf32> to vector<2x128xf32>
    %58 = arith.mulf %41, %57 : vector<2x128xf32>
    %c0_36 = arith.constant 0 : index
    %c0_37 = arith.constant 0 : index
    %59 = vector.load %arg14[%c0_36, %c0_37] : memref<2x128xf32, #tpu.memory_space<vmem>>, vector<2x128xf32>
    tpu.vector_store %arg14[%c0_36, %c0_37], %58 {strides = array<i32>} : memref<2x128xf32, #tpu.memory_space<vmem>>, vector<2x128xf32>,
    return
  }
  func.func @transform_0(%arg0: i32) -> (i32, i32) {
    %c0_i32 = arith.constant 0 : i32
    %c0_i32_0 = arith.constant 0 : i32
    return %arg0, %c0_i32 : i32, i32
  }
  func.func @transform_1(%arg0: i32) -> (i32, i32) {
    %c0_i32 = arith.constant 0 : i32
    %c0_i32_0 = arith.constant 0 : i32
    return %arg0, %c0_i32 : i32, i32
  }
  func.func @transform_2(%arg0: i32) -> (i32, i32) {
    %c0_i32 = arith.constant 0 : i32
    %c0_i32_0 = arith.constant 0 : i32
    return %arg0, %c0_i32 : i32, i32
  }
  func.func @transform_3(%arg0: i32) -> (i32, i32) {
    %c0_i32 = arith.constant 0 : i32
    %c0_i32_0 = arith.constant 0 : i32
    return %arg0, %c0_i32 : i32, i32
  }
  func.func @transform_4(%arg0: i32) -> (i32, i32) {
    %c0_i32 = arith.constant 0 : i32
    %c0_i32_0 = arith.constant 0 : i32
    %c0_i32_1 = arith.constant 0 : i32
    return %c0_i32, %c0_i32_0 : i32, i32
  }
  func.func @transform_5(%arg0: i32) -> (i32, i32) {
    %c0_i32 = arith.constant 0 : i32
    %c0_i32_0 = arith.constant 0 : i32
    %c0_i32_1 = arith.constant 0 : i32
    return %c0_i32, %c0_i32_0 : i32, i32
  }
  func.func @transform_6(%arg0: i32) -> (i32, i32) {
    %c0_i32 = arith.constant 0 : i32
    %c0_i32_0 = arith.constant 0 : i32
    %c0_i32_1 = arith.constant 0 : i32
    return %c0_i32, %c0_i32_0 : i32, i32
  }
  func.func @transform_7(%arg0: i32) -> (i32, i32) {
    %c0_i32 = arith.constant 0 : i32
    %c0_i32_0 = arith.constant 0 : i32
    %c0_i32_1 = arith.constant 0 : i32
    return %c0_i32, %c0_i32_0 : i32, i32
  }
  func.func @transform_8(%arg0: i32) -> (i32, i32) {
    %c0_i32 = arith.constant 0 : i32
    %c0_i32_0 = arith.constant 0 : i32
    %c0_i32_1 = arith.constant 0 : i32
    return %c0_i32, %c0_i32_0 : i32, i32
  }
  func.func @transform_9(%arg0: i32) -> (i32, i32) {
    %c0_i32 = arith.constant 0 : i32
    %c0_i32_0 = arith.constant 0 : i32
    %c0_i32_1 = arith.constant 0 : i32
    return %c0_i32, %c0_i32_0 : i32, i32
  }
  func.func @transform_10(%arg0: i32) -> (i32, i32) {
    %c0_i32 = arith.constant 0 : i32
    %c0_i32_0 = arith.constant 0 : i32
    %c0_i32_1 = arith.constant 0 : i32
    return %c0_i32, %c0_i32_0 : i32, i32
  }
  func.func @transform_11(%arg0: i32) -> (i32, i32) {
    %c0_i32 = arith.constant 0 : i32
    %c0_i32_0 = arith.constant 0 : i32
    %c0_i32_1 = arith.constant 0 : i32
    return %c0_i32, %c0_i32_0 : i32, i32
  }
  func.func @transform_12(%arg0: i32) -> (i32, i32) {
    %c0_i32 = arith.constant 0 : i32
    %c0_i32_0 = arith.constant 0 : i32
    return %arg0, %c0_i32 : i32, i32
  }
  func.func @transform_13(%arg0: i32) -> (i32, i32) {
    %c0_i32 = arith.constant 0 : i32
    %c0_i32_0 = arith.constant 0 : i32
    return %arg0, %c0_i32 : i32, i32
  }
}

</mosaic_0001>

<bundles_post_ra>
// kernel: tpu_custom_call.1
= control target key start
LH: loop header
LB: loop body
LE: loop exit
PB: predicated region body
PF: predicated region fallthrough
CT: control target
= control target key end

     0   :  { %19 = vsyncpa [#allocation3], 0  ;;  %s1217_s0 = inlined_call_operand.hbm [shape: bf16[32,128], index: 0, kind: input, shape index: {}]   ;;  %s1218_s1 = inlined_call_operand.hbm [shape: bf16[32,128], index: 1, kind: input, shape index: {}]   ;;  %s1219_s2 = inlined_call_operand.vmem [shape: s32[2,1], index: 2, kind: input, shape index: {}]   ;;  %s1220_s3 = inlined_call_operand.vmem [shape: f32[2,1], index: 3, kind: input, shape index: {}]   ;;  %s1221_s4 = inlined_call_operand.hbm [shape: bf16[128,128], index: 4, kind: input, shape index: {}]   ;;  %s1222_s5 = inlined_call_operand.vmem [shape: f32[1,128], index: 5, kind: input, shape index: {}]   ;;  %s1223_s6 = inlined_call_operand.hbm [shape: bf16[128,128], index: 6, kind: input, shape index: {}]   ;;  %s1224_s7 = inlined_call_operand.vmem [shape: f32[1,128], index: 7, kind: input, shape index: {}]   ;;  %s1225_s8 = inlined_call_operand.hbm [shape: bf16[128,128], index: 8, kind: input, shape index: {}]   ;;  %s1226_s9 = inlined_call_operand.vmem [shape: f32[1,128], index: 9, kind: input, shape index: {}]   ;;  %s1227_s10 = inlined_call_operand.hbm [shape: bf16[128,128], index: 10, kind: input, shape index: {}]   ;;  %s1228_s11 = inlined_call_operand.vmem [shape: f32[1,128], index: 11, kind: input, shape index: {}]   ;;  %s1229_s12 = inlined_call_operand.hbm [shape: f32[2,128], index: 12, kind: output, shape index: {0}]   ;;  %s1230_s13 = inlined_call_operand.hbm [shape: f32[2,128], index: 13, kind: output, shape index: {1}]  }
   0x1   :  { %20 = vsyncpa [#allocation6], 0 }
   0x2   :  { %21 = vsyncpa [#allocation9], 0 }
   0x3   :  { %22 = vsyncpa [#allocation12], 0 }
   0x4   :  { %23 = vsyncpa [#allocation4], 0 }
   0x5   :  { %24 = vsyncpa [#allocation15], 0  ;;  %s42_s27 = sshll.u32 %s1218_s1, 4  ;;  %s1076_s28 = smov [#allocation5]   ;;  %s43_s27 = int_to_ptr.hbm [resolvable:$true] %s42_s27 }
   0x6   :  { %s44_s29 = sshll.u32 %s1076_s28, 4  ;;  %s74_s15 = sshll.u32 %s1223_s6, 4  ;;  %s45_s29 = int_to_ptr.vmem [resolvable:$true] %s44_s29  ;;  %s75_s15 = int_to_ptr.hbm [resolvable:$true] %s74_s15 }
   0x7   :  { %s1077_s16 = smov 64   ;;  %s1078_s17 = smov 4  }
   0x8   :  { %50 = dma.hbm_to_vmem [thread:$0]  %s43_s27, 256, %s45_s29, [#allocation6], %s1077_s16, %s1077_s16, %s1078_s17  }
   0x9   :  { %s1079_s18 = smov [#allocation8]   ;;  %s29_s1 = sshll.u32 %s1217_s0, 4  ;;  %s30_s1 = int_to_ptr.hbm [resolvable:$true] %s29_s1 }
   0xa   :  { %s76_s19 = sshll.u32 %s1079_s18, 4  ;;  %s59_s23 = sshll.u32 %s1221_s4, 4  ;;  %s77_s19 = int_to_ptr.vmem [resolvable:$true] %s76_s19  ;;  %s60_s23 = int_to_ptr.hbm [resolvable:$true] %s59_s23 }
   0xb   :  { %82 = dma.hbm_to_vmem [thread:$0]  %s75_s15, 1024, %s77_s19, [#allocation9], %s1077_s16, %s1077_s16, %s1078_s17  }
   0xc   :  { %s1080_s24 = smov [#allocation2]   ;;  %s1081_s26 = smov [#allocation7]  }
   0xd   :  { %s31_s25 = sshll.u32 %s1080_s24, 4  ;;  %s61_s0 = sshll.u32 %s1081_s26, 4  ;;  %s32_s25 = int_to_ptr.vmem [resolvable:$true] %s31_s25  ;;  %s62_s0 = int_to_ptr.vmem [resolvable:$true] %s61_s0 }
   0xe   :  { %37 = dma.hbm_to_vmem [thread:$0]  %s30_s1, 256, %s32_s25, [#allocation3], %s1077_s16, %s1077_s16, %s1078_s17  }
   0xf   :  { %s89_s29 = sshll.u32 %s1225_s8, 4  ;;  %s104_s14 = sshll.u32 %s1227_s10, 4  ;;  %s90_s29 = int_to_ptr.hbm [resolvable:$true] %s89_s29  ;;  %s105_s14 = int_to_ptr.hbm [resolvable:$true] %s104_s14 }
  0x10   :  { %67 = dma.hbm_to_vmem [thread:$0]  %s60_s23, 1024, %s62_s0, [#allocation6], %s1077_s16, %s1077_s16, %s1078_s17  }
  0x11   :  { %s1082_s15 = smov [#allocation10]   ;;  %s1083_s19 = smov [#allocation11]  }
  0x12   :  { %s91_s18 = sshll.u32 %s1082_s15, 4  ;;  %s106_s8 = sshll.u32 %s1083_s19, 4  ;;  %s92_s18 = int_to_ptr.vmem [resolvable:$true] %s91_s18  ;;  %s107_s8 = int_to_ptr.vmem [resolvable:$true] %s106_s8 }
  0x13   :  { %97 = dma.hbm_to_vmem [thread:$0]  %s90_s29, 1024, %s92_s18, [#allocation9], %s1077_s16, %s1077_s16, %s1078_s17  }
  0x14   :  { %112 = dma.hbm_to_vmem [thread:$0]  %s105_s14, 1024, %s107_s8, [#allocation12], %s1077_s16, %s1077_s16, %s1078_s17  }
  0x15   :  { %1064 = dma.done.wait [#allocation3], 256  }
  0x16   :  { %1065 = vsyncadd [#allocation3], 4294967040 }
  0x17   :  { %1066 = dma.done.wait [#allocation6], 1280  }
  0x18   :  { %1067 = vsyncadd [#allocation6], 4294966016 }
  0x19   :  { %1068 = dma.done.wait [#allocation9], 2048  }
  0x1a   :  { %1069 = vsyncadd [#allocation9], 4294965248 }
  0x1b   :  { %1070 = dma.done.wait [#allocation12], 1024  }
  0x1c   :  { %1071 = vsyncadd [#allocation12], 4294966272  ;;  %v824_v0 = vld [vmem:[#allocation7 + $0x38] sm:$0xff]  ;;  %v823_v2 = vld [vmem:[#allocation7 + $0x30] sm:$0xff]  ;;  %v1084_v4 = vmov 0   ;;  %v359_v32 = vlaneseq  ;;  %vm444_vm4 = vcmask 1041409  }
  0x1d   :  { %v834_v1 = vld [vmem:[#allocation8 + $0x38] sm:$0xff]  ;;  %219 = vmatpush.bf16.msra.mxu0 %v824_v0  ;;  %v833_v3 = vld [vmem:[#allocation8 + $0x30] sm:$0xff]  ;;  %863 = vset.pattern.permute.xlu1 %v1084_v4  ;;  %v822_v5 = vld [vmem:[#allocation7 + $0x28] sm:$0xff]  ;;  %vm601_vm5 = vcmask 1041408   ;;  %s642_s25 = sshll.u32 %s1229_s12, 4  ;;  %s1086_s26 = smov [#allocation14]   ;;  %s643_s25 = int_to_ptr.hbm [resolvable:$true] %s642_s25 }
  0x1e   :  { %340 = vmatpush.bf16.msra.mxu1 %v834_v1  ;;  %862 = vset.pattern.permute.xlu0 %v1084_v4  ;;  %v832_v6 = vld [vmem:[#allocation8 + $0x28] sm:$0xff]  ;;  %v362_v7 = vld [vmem:[%s1219_s2] sm:$0x3]  ;;  %v820_v11 = vld [vmem:[#allocation7 + $0x18] sm:$0xff]  ;;  %v360_v35 = vshrl.u32 %v359_v32, 7  ;;  %s651_s0 = sshll.u32 %s1086_s26, 4  ;;  %s652_s0 = int_to_ptr.vmem [resolvable:$true] %s651_s0 }
  0x1f   :  { %v367_v8 = vperm.slane %v362_v7, 0  ;;  %v821_v9 = vld [vmem:[#allocation7 + $0x20] sm:$0xff]  ;;  %v830_v12 = vld [vmem:[#allocation8 + $0x18] sm:$0xff]  ;;  %v363_v15 = vrot.slane %v362_v7, 1  ;;  %v819_v16 = vld [vmem:[#allocation7 + $0x10] sm:$0xff]  ;;  %s653_s29 = sshll.u32 %s1230_s13, 4  ;;  %s654_s29 = int_to_ptr.hbm [resolvable:$true] %s653_s29 }
  0x20   :  { %v831_v10 = vld [vmem:[#allocation8 + $0x20] sm:$0xff]  ;;  %v829_v17 = vld [vmem:[#allocation8 + $0x10] sm:$0xff]  ;;  %v818_v20 = vld [vmem:[#allocation7 + $0x8] sm:$0xff]  ;;  %v361_v38 = vadd.s32 8, %v360_v35 }
  0x21   :  { %220 = vmatpush.bf16.msra.mxu0 %v823_v2  ;;  %370 = vperm.xlu1 %863, %v367_v8   ;;  %v364_v13 = vld [vmem:[%s1220_s3] sm:$0x3]  ;;  %v368_v18 = vperm.slane %v363_v15, 0  ;;  %v828_v21 = vld [vmem:[#allocation8 + $0x8] sm:$0xff]  ;;  %v825_v26 = vld [vmem:[#allocation5] sm:$0xff] }
  0x22   :  { %341 = vmatpush.bf16.msra.mxu1 %v833_v3  ;;  %v379_v14 = vperm.slane %v364_v13, 0  ;;  %v366_v19 = vrot.slane %v364_v13, 1  ;;  %v817_v23 = vld [vmem:[#allocation7] sm:$0xff]  ;;  %v816_v27 = vld [vmem:[#allocation2 + $0x8] sm:$0xff]  ;;  %v826_v28 = vld [vmem:[#allocation5 + $0x8] sm:$0xff] }
  0x23   :  { %373 = vperm.xlu0 %862, %v368_v18   ;;  %v827_v24 = vld [vmem:[#allocation8] sm:$0xff]  ;;  %v842_v29 = vld [vmem:[#allocation10 + $0x38] sm:$0xff]  ;;  %v841_v33 = vld [vmem:[#allocation10 + $0x30] sm:$0xff] }
  0x24   :  { %v380_v22 = vperm.slane %v366_v19, 0  ;;  %v815_v25 = vld [vmem:[#allocation2] sm:$0xff]  ;;  %v850_v30 = vld [vmem:[#allocation11 + $0x38] sm:$0xff]  ;;  %496 = vmatpush.bf16.msra.mxu2 %v842_v29  ;;  %v849_v34 = vld [vmem:[#allocation11 + $0x30] sm:$0xff] }
  0x25   :  { %221 = vmatpush.bf16.msra.mxu0 %v822_v5  ;;  %587 = vmatpush.bf16.msra.mxu3 %v850_v30  ;;  %v840_v36 = vld [vmem:[#allocation10 + $0x28] sm:$0xff]  ;;  %v839_v39 = vld [vmem:[#allocation10 + $0x20] sm:$0xff]  ;;  %v838_v44 = vld [vmem:[#allocation10 + $0x18] sm:$0xff] }
  0x26   :  { %342 = vmatpush.bf16.msra.mxu1 %v832_v6  ;;  %v848_v37 = vld [vmem:[#allocation11 + $0x28] sm:$0xff]  ;;  %v847_v40 = vld [vmem:[#allocation11 + $0x20] sm:$0xff]  ;;  %v846_v45 = vld [vmem:[#allocation11 + $0x18] sm:$0xff] }
  0x27   :  { %v837_v50 = vld [vmem:[#allocation10 + $0x10] sm:$0xff]  ;;  %v836_v56 = vld [vmem:[#allocation10 + $0x8] sm:$0xff]  ;;  %v835_v60 = vld [vmem:[#allocation10] sm:$0xff] }
  0x28   :  { %497 = vmatpush.bf16.msra.mxu2 %v841_v33  ;;  %v845_v51 = vld [vmem:[#allocation11 + $0x10] sm:$0xff]  ;;  %v844_v57 = vld [vmem:[#allocation11 + $0x8] sm:$0xff]  ;;  %v843_v61 = vld [vmem:[#allocation11] sm:$0xff] }
  0x29   :  { %222 = vmatpush.bf16.msra.mxu0 %v821_v9  ;;  %382 = vperm.xlu1 %863, %v379_v14   ;;  %v864_v30 = vld [vmem:[%s1222_s5] ss:$0 sm:$0xff] }
  0x2a   :  { %343 = vmatpush.bf16.msra.mxu1 %v831_v10  ;;  %588 = vmatpush.bf16.msra.mxu3 %v849_v34 }
  0x2b   :  { %386 = vperm.xlu0 %862, %v380_v22  }
  0x2c   :  { %498 = vmatpush.bf16.msra.mxu2 %v840_v36 }
  0x2d   :  { %223 = vmatpush.bf16.msra.mxu0 %v820_v11 }
  0x2e   :  { %344 = vmatpush.bf16.msra.mxu1 %v830_v12  ;;  %589 = vmatpush.bf16.msra.mxu3 %v848_v37 }
  0x30   :  { %499 = vmatpush.bf16.msra.mxu2 %v839_v39 }
  0x31   :  { %224 = vmatpush.bf16.msra.mxu0 %v819_v16 }
  0x32   :  { %345 = vmatpush.bf16.msra.mxu1 %v829_v17  ;;  %590 = vmatpush.bf16.msra.mxu3 %v847_v40 }
  0x34   :  { %500 = vmatpush.bf16.msra.mxu2 %v838_v44 }
  0x35   :  { %225 = vmatpush.bf16.msra.mxu0 %v818_v20 }
  0x36   :  { %346 = vmatpush.bf16.msra.mxu1 %v828_v21  ;;  %591 = vmatpush.bf16.msra.mxu3 %v846_v45 }
  0x38   :  { %501 = vmatpush.bf16.msra.mxu2 %v837_v50 }
  0x39   :  { %226 = vmatpush.bf16.msra.mxu0 %v817_v23 }
  0x3a   :  { %347 = vmatpush.bf16.msra.mxu1 %v827_v24  ;;  %592 = vmatpush.bf16.msra.mxu3 %v845_v51 }
  0x3c   :  { %227 = vmatmul.bf16.vlgmr.msra.gmra.mxu0 %v815_v25  ;;  %502 = vmatpush.bf16.msra.mxu2 %v836_v56 }
  0x3d   :  { %348 = vmatmul.bf16.vlgmr.msra.gmra.mxu1 %v825_v26 }
  0x3e   :  { %593 = vmatpush.bf16.msra.mxu3 %v844_v57 }
  0x40   :  { %503 = vmatpush.bf16.msra.mxu2 %v835_v60 }
  0x42   :  { %594 = vmatpush.bf16.msra.mxu3 %v843_v61 }
  0x4c   :  { %232 = vmatmul.bf16.gmra.mxu0 %v816_v27 }
  0x4d   :  { %353 = vmatmul.bf16.gmra.mxu1 %v826_v28 }
  0x93   :  { %v371_v31 = vpop.permute.xlu1 %370 }
  0x94   :  { %vm375_vm0 = vcmp.lt.s32.totalorder %v360_v35, %v371_v31  ;;  %vm376_vm1 = vcmp.lt.s32.totalorder %v361_v38, %v371_v31  ;;  %v865_v31 = vld [vmem:[%s1224_s7] ss:$0 sm:$0xff] }
  0x95   :  { %v374_v49 = vpop.permute.xlu0 %373 }
  0x96   :  { %vm377_vm2 = vcmp.lt.s32.totalorder %v360_v35, %v374_v49  ;;  %vm378_vm3 = vcmp.lt.s32.totalorder %v361_v38, %v374_v49 }
  0x9b   :  { %v383_v43 = vpop.permute.xlu1 %382 }
  0x9c   :  { %v389_v46 = vsel %vm375_vm0, %v383_v43, 0.0  ;;  %v390_v47 = vsel %vm376_vm1, %v383_v43, 0.0 }
  0x9d   :  { %v387_v2 = vpop.permute.xlu0 %386 }
  0x9e   :  { %v391_v5 = vsel %vm377_vm2, %v387_v2, 0.0  ;;  %v392_v6 = vsel %vm378_vm3, %v387_v2, 0.0 }
  0xb9   :  { %v228_v41 = vpop.f32.mrf.mxu0 }
  0xba   :  { %v349_v42 = vpop.f32.mrf.mxu1 }
  0xbb   :  { %v393_v48 = vmul.f32 %v389_v46, %v349_v42 }
  0xc1   :  { %v230_v52 = vpop.f32.mrf.mxu0 }
  0xc2   :  { %v351_v53 = vpop.f32.mrf.mxu1  ;;  %v238_v54 = vadd.f32 %v230_v52, %v228_v41 }
  0xc3   :  { %v394_v55 = vmul.f32 %v390_v47, %v351_v53 }
  0xc4   :  { %v239_v58 = vrot.slane %v238_v54, 4 }
  0xc5   :  { %v397_v59 = vadd.f32 %v394_v55, %v393_v48 }
  0xc6   :  { %v240_v62 = vadd.f32 %v239_v58, %v238_v54  ;;  %v866_v54 = vld [vmem:[%s1226_s9] ss:$0 sm:$0xff]  ;;  %s1085_s9 = smov [#allocation13]  }
  0xc7   :  { %v398_v63 = vrot.slane %v397_v59, 4  ;;  %v867_v58 = vld [vmem:[%s1228_s11] ss:$0 sm:$0xff]  ;;  %s640_s11 = sshll.u32 %s1085_s9, 4  ;;  %s641_s11 = int_to_ptr.vmem [resolvable:$true] %s640_s11 }
  0xc8   :  { %v241_v3 = vrot.slane %v240_v62, 2 }
  0xc9   :  { %v233_v0 = vpop.f32.mrf.mxu0  ;;  %v399_v4 = vadd.f32 %v398_v63, %v397_v59 }
  0xca   :  { %v354_v1 = vpop.f32.mrf.mxu1  ;;  %v242_v7 = vadd.f32 %v241_v3, %v240_v62 }
  0xcb   :  { %v400_v8 = vrot.slane %v399_v4, 2  ;;  %v395_v9 = vmul.f32 %v391_v5, %v354_v1 }
  0xcc   :  { %v243_v14 = vrot.slane %v242_v7, 1 }
  0xcd   :  { %v401_v15 = vadd.f32 %v400_v8, %v399_v4 }
  0xce   :  { %v244_v20 = vadd.f32 %v243_v14, %v242_v7 }
  0xcf   :  { %v402_v21 = vrot.slane %v401_v15, 1 }
  0xd0   :  { %v252_v26 = vmul.f32 0.0625, %v244_v20 }
  0xd1   :  { %v235_v10 = vpop.f32.mrf.mxu0  ;;  %v403_v27 = vadd.f32 %v402_v21, %v401_v15 }
  0xd2   :  { %v356_v11 = vpop.f32.mrf.mxu1  ;;  %v245_v12 = vadd.f32 %v235_v10, %v233_v0  ;;  %v258_v36 = vadd.f32 %v864_v30, %v252_v26 }
  0xd3   :  { %v396_v13 = vmul.f32 %v392_v6, %v356_v11  ;;  %v415_v37 = vadd.f32 %v865_v31, %v403_v27 }
  0xd4   :  { %v246_v16 = vrot.slane %v245_v12, 4  ;;  %v417_v40 = vpack.c.bf16 %v258_v36, %v258_v36 }
  0xd5   :  { %v404_v17 = vadd.f32 %v396_v13, %v395_v9  ;;  %v509_v42 = vpack.c.bf16 %v415_v37, %v415_v37 }
  0xd6   :  { %v247_v18 = vadd.f32 %v246_v16, %v245_v12  ;;  %v441_v46 = vunpack.c.l.b16 %v417_v40 }
  0xd7   :  { %v405_v19 = vrot.slane %v404_v17, 4  ;;  %v533_v48 = vunpack.c.l.b16 %v509_v42 }
  0xd8   :  { %v248_v22 = vrot.slane %v247_v18, 2 }
  0xd9   :  { %v406_v23 = vadd.f32 %v405_v19, %v404_v17 }
  0xda   :  { %v249_v24 = vadd.f32 %v248_v22, %v247_v18 }
  0xdb   :  { %v407_v25 = vrot.slane %v406_v23, 2 }
  0xdc   :  { %v250_v28 = vrot.slane %v249_v24, 1 }
  0xdd   :  { %v408_v29 = vadd.f32 %v407_v25, %v406_v23 }
  0xde   :  { %v251_v32 = vadd.f32 %v250_v28, %v249_v24 }
  0xdf   :  { %v409_v33 = vrot.slane %v408_v29, 1 }
  0xe0   :  { %v253_v34 = vmul.f32 0.0625, %v251_v32 }
  0xe1   :  { %v410_v35 = vadd.f32 %v409_v33, %v408_v29 }
  0xe2   :  { %v259_v38 = vadd.f32 %v864_v30, %v253_v34 }
  0xe3   :  { %v416_v39 = vadd.f32 %v865_v31, %v410_v35 }
  0xe4   :  { %v418_v41 = vpack.c.bf16 %v259_v38, %v259_v38 }
  0xe5   :  { %v510_v43 = vpack.c.bf16 %v416_v39, %v416_v39 }
  0xe6   :  { %v442_v44 = vunpack.c.l.b16 %v418_v41 }
  0xe7   :  { %v534_v45 = vunpack.c.l.b16 %v510_v43 }
  0xe8   :  { %v443_v47 = vrot.slane %v442_v44, 7 }
  0xe9   :  { %v535_v49 = vrot.slane %v534_v45, 7 }
  0xea   :  { %v445_v50 = vsel %vm444_vm4, %v443_v47, %v441_v46 }
  0xeb   :  { %v536_v51 = vsel %vm444_vm4, %v535_v49, %v533_v48  ;;  %v446_v52 = vpack.c.b16 %v445_v50, %v445_v50 }
  0xec   :  { %v537_v53 = vpack.c.b16 %v536_v51, %v536_v51 }
  0xed   :  { %504 = vmatmul.bf16.vlgmr.msra.gmra.mxu2 %v446_v52 }
  0xee   :  { %595 = vmatmul.bf16.vlgmr.msra.gmra.mxu3 %v537_v53 }
 0x170   :  { %v505_v55 = vpop.f32.mrf.mxu2 }
 0x171   :  { %v596_v56 = vpop.f32.mrf.mxu3  ;;  %v506_v57 = vadd.f32 %v866_v54, %v505_v55 }
 0x172   :  { %v597_v60 = vadd.f32 %v867_v58, %v596_v56 }
 0x173   :  { %v600_v59 = vmul.f32 %v506_v57, %v506_v57 }
 0x174   :  { %v618_v0 = vmul.f32 %v597_v60, %v597_v60 }
 0x175   :  { %v602_v61 = vsel %vm601_vm5, %v600_v59, 0.0 }
 0x176   :  { %603 = vadd.xlane.f32.xlu2 %v602_v61  ;;  %v619_v1 = vsel %vm601_vm5, %v618_v0, 0.0 }
 0x178   :  { %v507_v62 = vpop.f32.mrf.mxu2 }
 0x179   :  { %v598_v63 = vpop.f32.mrf.mxu3 }
 0x17e   :  { %620 = vadd.xlane.f32.xlu2 %v619_v1 }
 0x1e9   :  { %v604_v2 = vpop.xlane.xlu2 %603 }
 0x1ea   :  { %v605_v3 = vmax.f32 %v604_v2, 1e-24 }
 0x1ec   :  { %868 = vrsqrt.f32 %v605_v3  ;;  %vm612_vm7 = vweird.f32 %v605_v3 }
 0x1f1   :  { %v621_v4 = vpop.xlane.xlu2 %620 }
 0x1f2   :  { %v869_v5 = vpop.eup %868  ;;  %v622_v6 = vmax.f32 %v621_v4, 1e-24 }
 0x1f3   :  { %v607_v7 = vmul.f32 %v869_v5, %v605_v3  ;;  %vm613_vm6 = vweird.f32 %v869_v5 }
 0x1f4   :  { %870 = vrsqrt.f32 %v622_v6  ;;  %vm614_vm8 = vmor %vm612_vm7, %vm613_vm6  ;;  %vm629_vm10 = vweird.f32 %v622_v6 }
 0x1f5   :  { %v608_v8 = vmul.f32 %v869_v5, %v607_v7 }
 0x1f7   :  { %v609_v9 = vmul.f32 0.5, %v608_v8 }
 0x1f9   :  { %v610_v10 = vsub.f32 1.5, %v609_v9 }
 0x1fa   :  { %v871_v11 = vpop.eup %870 }
 0x1fb   :  { %v611_v12 = vmul.f32 %v869_v5, %v610_v10  ;;  %v624_v13 = vmul.f32 %v871_v11, %v622_v6  ;;  %vm630_vm9 = vweird.f32 %v871_v11 }
 0x1fc   :  { %vm631_vm11 = vmor %vm629_vm10, %vm630_vm9 }
 0x1fd   :  { %v625_v14 = vmul.f32 %v871_v11, %v624_v13  ;;  %v615_v15 = vsel %vm614_vm8, %v869_v5, %v611_v12 }
 0x1fe   :  { %v616_v16 = vmul.f32 %v615_v15, %v506_v57 }
 0x1ff   :  { %v626_v17 = vmul.f32 0.5, %v625_v14 }
 0x200   :  { %617 = vst [vmem:[#allocation13] sm:$0x3] %v616_v16 }
 0x201   :  { %v627_v18 = vsub.f32 1.5, %v626_v17  ;;  %645 = dma.vmem_to_hbm [thread:$0]  %s641_s11, 32, %s643_s25, [#allocation4]  }
 0x203   :  { %v628_v19 = vmul.f32 %v871_v11, %v627_v18 }
 0x205   :  { %v632_v20 = vsel %vm631_vm11, %v871_v11, %v628_v19 }
 0x206   :  { %v633_v21 = vmul.f32 %v632_v20, %v597_v60 }
 0x208   :  { %634 = vst [vmem:[#allocation14] sm:$0x3] %v633_v21 }
 0x209   :  { %656 = dma.vmem_to_hbm [thread:$0]  %s652_s0, 32, %s654_s29, [#allocation15]  }
 0x20a   :  { %1072 = dma.done.wait [#allocation4], 32  }
 0x20b   :  { %1073 = vsyncadd [#allocation4], 4294967264 }
 0x20c   :  { %1074 = dma.done.wait [#allocation15], 32  }
 0x20d   :  { %1075 = vsyncadd [#allocation15], 4294967264 }
 0x20e   :  { %665 = vsyncpa [#allocation3], 1 }
 0x20f   :  { %666 = vsyncpa [#allocation6], 1 }
 0x210   :  { %667 = vsyncpa [#allocation9], 1 }
 0x211   :  { %668 = vsyncpa [#allocation12], 1 }
 0x212   :  { %669 = vsyncpa [#allocation4], 1 }
 0x213   :  { %670 = vsyncpa [#allocation15], 1 }

</bundles_post_ra>
